<compile_context>
chip_gen: v7x
topology: tpu7x:2x2x1
jax: 0.10.0
libtpu: 0.0.40
codegen_flags: <defaults>
</compile_context>

<pallas_src>
import functools

import jax
import jax.numpy as jnp
from jax.experimental import pallas as pl
from jax.experimental.pallas import tpu as pltpu


def _round_up(x, m):
    return ((x + m - 1) // m) * m


def _rep_spec(shape):
    """Full-array block, same block for every grid step (weights: no re-DMA)."""
    n = len(shape)
    return pl.BlockSpec(tuple(shape), lambda i, _n=n: (0,) * _n)


def _batch_spec(shape, tb):
    """Tile the leading (batch) axis with block size `tb`, full extent elsewhere."""
    n = len(shape)
    return pl.BlockSpec((tb,) + tuple(shape[1:]), lambda i, _n=n: (i,) + (0,) * (_n - 1))


# Rows of the packed [5, H] f32 "vec" parameter array.
_ROW_BA, _ROW_WS, _ROW_BA2, _ROW_WS2, _ROW_BS = 0, 1, 2, 3, 4


def _prediction_kernel(
    c_ref, left_ref, lmask_ref, enc_ref, emb_ref, smask_ref, nmask_ref,
    wg_ref, bg_ref, wah_ref, wae_ref, vec_ref, wleaf_ref, bleaf_ref, wa2n_ref,
    out_ref, *, H, OP, W,
):
    TB = c_ref.shape[0]          # batch tile
    Sp = enc_ref.shape[1]        # padded sequence length
    Np = emb_ref.shape[1]        # padded number-embedding count

    vp = vec_ref[...]                                  # [5, H] f32
    ba = vp[_ROW_BA:_ROW_BA + 1, :]                    # [1, H]
    ws = vp[_ROW_WS:_ROW_WS + 1, :]
    ba2 = vp[_ROW_BA2:_ROW_BA2 + 1, :]
    ws2 = vp[_ROW_WS2:_ROW_WS2 + 1, :]
    bs = vp[_ROW_BS:_ROW_BS + 1, 0:1]                  # [1, 1]

    # --- fused gating: one [TB,2H] @ [2H,4H] MXU pass gives all four gates.
    lc = jnp.concatenate([left_ref[...], c_ref[...]], axis=1)             # [TB, 2H] bf16
    gates = jnp.dot(lc, wg_ref[...], preferred_element_type=jnp.float32) + bg_ref[...]
    g_l = jnp.tanh(gates[:, 0:H])
    t_l = jax.nn.sigmoid(gates[:, H:2 * H])
    g_r = jnp.tanh(gates[:, 2 * H:3 * H])
    t_r = jax.nn.sigmoid(gates[:, 3 * H:4 * H])
    node = jnp.where(lmask_ref[...] > 0.5, g_r * t_r, g_l * t_l)          # [TB, H] f32

    # --- TreeAttn: score = ws . tanh(Wa [node ; enc]) ; masked softmax over S.
    enc = enc_ref[...]                                                     # [TB, Sp, H] bf16
    h_part = jnp.dot(node.astype(jnp.bfloat16), wah_ref[...],
                     preferred_element_type=jnp.float32)                   # [TB, H]
    e_part = jnp.dot(enc.reshape(TB * Sp, H), wae_ref[...],
                     preferred_element_type=jnp.float32).reshape(TB, Sp, H)
    feat = jnp.tanh(h_part[:, None, :] + e_part + ba[None])                # [TB, Sp, H]
    energies = jnp.sum(feat * ws[None], axis=-1) + bs                      # [TB, Sp]
    energies = jnp.where(smask_ref[...] > 0.5, -1e12, energies)
    m = jnp.max(energies, axis=-1, keepdims=True)
    p = jnp.exp(energies - m)
    attn = p * pl.reciprocal(jnp.sum(p, axis=-1, keepdims=True), approx=True)
    ctx = jnp.sum(attn[:, :, None] * enc, axis=1)                          # [TB, H] f32

    # --- fused leaf projection: Score.attn "leaf" part + operator logits in one matmul.
    leaf = jnp.concatenate([node, ctx], axis=1).astype(jnp.bfloat16)       # [TB, 2H]
    proj = jnp.dot(leaf, wleaf_ref[...],
                   preferred_element_type=jnp.float32) + bleaf_ref[...]    # [TB, H+OP]
    l_part = proj[:, 0:H]
    op = proj[:, H:H + OP]

    # --- Score over [constant ; copied-number] embeddings.
    emb = emb_ref[...]                                                     # [TB, Np, H] bf16
    n_part = jnp.dot(emb.reshape(TB * Np, H), wa2n_ref[...],
                     preferred_element_type=jnp.float32).reshape(TB, Np, H)
    feat2 = jnp.tanh(l_part[:, None, :] + n_part + ba2[None])              # [TB, Np, H]
    nscore = jnp.sum(feat2 * ws2[None], axis=-1)                           # [TB, Np]
    nscore = jnp.where(nmask_ref[...] > 0.5, -1e12, nscore)

    # --- single lane-dense packed store: [nscore | op | node | ctx | zero-pad]
    pieces = [nscore, op, node, ctx]
    pad_w = W - (Np + OP + 2 * H)
    if pad_w > 0:
        pieces.append(jnp.zeros((TB, pad_w), jnp.float32))
    out_ref[...] = jnp.concatenate(pieces, axis=1)


# ---------------------------------------------------------------------------
# Wrapper-side preparation (hoisted out of the per-decode-step path)
# ---------------------------------------------------------------------------

def pack_weights(params):
    """Fuse / transpose / cast weights once per model."""
    bf = jnp.bfloat16
    H = params["wl"].shape[0]
    zH = jnp.zeros((H, H), jnp.float32)
    w_gate = jnp.concatenate([
        jnp.concatenate([zH, params["wl"]], axis=0),     # lc @ [0;wl]  == c @ wl
        jnp.concatenate([zH, params["wlg"]], axis=0),
        params["wr"], params["wrg"],
    ], axis=1).astype(bf)                                                 # [2H, 4H]
    b_gate = jnp.concatenate(
        [params["bl"], params["blg"], params["br"], params["brg"]], axis=1)   # [1, 4H]
    wa_h = params["wa"][:H].astype(bf)                                    # [H, H]
    wa_e = params["wa"][H:].astype(bf)                                    # [H, H]
    vec = jnp.concatenate([
        params["ba"], params["ws"], params["ba2"], params["ws2"],
        jnp.broadcast_to(params["bs"], (1, H)),
    ], axis=0).astype(jnp.float32)                                        # [5, H]
    w_leaf = jnp.concatenate(
        [params["wa2"][:2 * H, :], params["wops"]], axis=1).astype(bf)    # [2H, H+OP]
    b_leaf = jnp.concatenate(
        [jnp.zeros((1, H), jnp.float32), params["bops"]], axis=1)         # [1, H+OP]
    wa2_n = params["wa2"][2 * H:].astype(bf)                              # [H, H]
    return dict(w_gate=w_gate, b_gate=b_gate, wa_h=wa_h, wa_e=wa_e, vec=vec,
                w_leaf=w_leaf, b_leaf=b_leaf, wa2_n=wa2_n,
                emb_w=params["emb_w"].astype(jnp.float32))


def prepare_encoder(encoder_outputs, seq_mask):
    """Once per problem: [S,B,H] -> padded bf16 [B,Sp,H] + padded seq mask."""
    S, B, H = encoder_outputs.shape
    Sp = _round_up(S, 8)
    enc = jnp.transpose(encoder_outputs, (1, 0, 2)).astype(jnp.bfloat16)
    enc = jnp.pad(enc, ((0, 0), (0, Sp - S), (0, 0)))
    smask = jnp.pad(seq_mask.astype(jnp.float32), ((0, 0), (0, Sp - S)),
                    constant_values=1.0)
    return enc, smask


def prediction_step(packed, enc_bf, smask_p, current_emb, left, left_mask,
                    num_pades, mask_nums):
    B, H = current_emb.shape
    OP = packed["b_leaf"].shape[1] - H

    # constant + copied-number embeddings (returned to the caller, like PyTorch)
    emb_w = jnp.broadcast_to(packed["emb_w"], (B,) + packed["emb_w"].shape[1:])
    emb_full = jnp.concatenate([emb_w, num_pades.astype(jnp.float32)], axis=1)   # [B, N, H]
    N = emb_full.shape[1]
    Np = _round_up(N, 8)
    emb_bf = jnp.pad(emb_full, ((0, 0), (0, Np - N), (0, 0))).astype(jnp.bfloat16)
    nmask = jnp.pad(mask_nums.astype(jnp.float32), ((0, 0), (0, Np - N)),
                    constant_values=1.0)

    W = _round_up(Np + OP + 2 * H, 128)          # lane-dense packed output width
    TB = 8 if B % 8 == 0 else B                  # batch tile (parallel across TCs on v7x)
    nb = B // TB

    c_bf = current_emb.astype(jnp.bfloat16)
    l_bf = left.astype(jnp.bfloat16)
    lmask = left_mask.astype(jnp.float32).reshape(B, 1)

    inputs = [
        c_bf, l_bf, lmask, enc_bf, emb_bf, smask_p, nmask,
        packed["w_gate"], packed["b_gate"], packed["wa_h"], packed["wa_e"],
        packed["vec"], packed["w_leaf"], packed["b_leaf"], packed["wa2_n"],
    ]
    in_specs = [
        _batch_spec(c_bf.shape, TB), _batch_spec(l_bf.shape, TB),
        _batch_spec(lmask.shape, TB), _batch_spec(enc_bf.shape, TB),
        _batch_spec(emb_bf.shape, TB), _batch_spec(smask_p.shape, TB),
        _batch_spec(nmask.shape, TB),
    ] + [_rep_spec(x.shape) for x in inputs[7:]]

    kernel = functools.partial(_prediction_kernel, H=H, OP=OP, W=W)
    out = pl.pallas_call(
        kernel,
        out_shape=jax.ShapeDtypeStruct((B, W), jnp.float32),
        grid_spec=pltpu.PrefetchScalarGridSpec(
            num_scalar_prefetch=0,
            grid=(nb,),
            in_specs=in_specs,
            out_specs=_batch_spec((B, W), TB),
        ),
        compiler_params=pltpu.CompilerParams(
            dimension_semantics=("parallel",),
            vmem_limit_bytes=32 * 1024 * 1024,
        ),
    )(*inputs)

    num_score = out[:, :N]
    op = out[:, Np:Np + OP]
    node = out[:, Np + OP:Np + OP + H]
    ctx = out[:, Np + OP + H:Np + OP + 2 * H]
    # PyTorch returns current_node / current_context as [B, 1, H]
    return num_score, op, node[:, None, :], ctx[:, None, :], emb_full


# ---------------------------------------------------------------------------
# Parameter init + pure-jnp (f32) reference of the PyTorch forward (eval mode)
# ---------------------------------------------------------------------------

def init_params(key, H, op_nums, input_size):
    ks = jax.random.split(key, 16)

    def nrm(k, shape, scale):
        return (scale * jax.random.normal(k, shape)).astype(jnp.float32)

    return {
        "emb_w": nrm(ks[0], (1, input_size, H), 1.0),
        "wl":  nrm(ks[1], (H, H), 0.1),      "bl":  nrm(ks[2], (1, H), 0.1),
        "wlg": nrm(ks[3], (H, H), 0.1),      "blg": nrm(ks[4], (1, H), 0.1),
        "wr":  nrm(ks[5], (2 * H, H), 0.1),  "br":  nrm(ks[6], (1, H), 0.1),
        "wrg": nrm(ks[7], (2 * H, H), 0.1),  "brg": nrm(ks[8], (1, H), 0.1),
        "wa":  nrm(ks[9], (2 * H, H), 0.1),  "ba":  nrm(ks[10], (1, H), 0.1),
        "ws":  nrm(ks[11], (1, H), 0.1),     "bs":  jnp.zeros((1, 1), jnp.float32),
        "wa2": nrm(ks[12], (3 * H, H), 0.1), "ba2": nrm(ks[13], (1, H), 0.1),
        "ws2": nrm(ks[14], (1, H), 0.1),
        "wops": nrm(ks[15], (2 * H, op_nums), 0.1),
        "bops": jnp.zeros((1, op_nums), jnp.float32),
    }


def _reference(params, current_emb, left, left_mask, encoder_outputs,
               num_pades, seq_mask, mask_nums):
    B, H = current_emb.shape
    c, l = current_emb, left
    g_l = jnp.tanh(c @ params["wl"] + params["bl"])
    t_l = jax.nn.sigmoid(c @ params["wlg"] + params["blg"])
    lc = jnp.concatenate([l, c], axis=1)
    g_r = jnp.tanh(lc @ params["wr"] + params["br"])
    t_r = jax.nn.sigmoid(lc @ params["wrg"] + params["brg"])
    node = jnp.where(left_mask > 0.5, g_r * t_r, g_l * t_l)

    enc = jnp.transpose(encoder_outputs, (1, 0, 2))
    S = enc.shape[1]
    hid = jnp.broadcast_to(node[:, None, :], (B, S, H))
    feat = jnp.tanh(jnp.concatenate([hid, enc], axis=2) @ params["wa"] + params["ba"])
    energies = jnp.squeeze(feat @ params["ws"].T, -1) + params["bs"]
    energies = jnp.where(seq_mask > 0.5, -1e12, energies)
    m = jnp.max(energies, axis=-1, keepdims=True)
    p = jnp.exp(energies - m)
    attn = p / jnp.sum(p, axis=-1, keepdims=True)
    ctx = jnp.einsum("bs,bsh->bh", attn, enc)

    emb_w = jnp.broadcast_to(params["emb_w"], (B,) + params["emb_w"].shape[1:])
    emb = jnp.concatenate([emb_w, num_pades], axis=1)
    Nn = emb.shape[1]
    leaf = jnp.concatenate([node, ctx], axis=1)
    leaf_rep = jnp.broadcast_to(leaf[:, None, :], (B, Nn, 2 * H))
    feat2 = jnp.tanh(jnp.concatenate([leaf_rep, emb], axis=2) @ params["wa2"] + params["ba2"])
    nscore = jnp.squeeze(feat2 @ params["ws2"].T, -1)
    nscore = jnp.where(mask_nums > 0.5, -1e12, nscore)
    op = leaf @ params["wops"] + params["bops"]
    return nscore, op, node, ctx


if __name__ == "__main__":
    B, H, S = 2, 32, 8
    input_size = 4     # learned constant embeddings
    num_size = 3       # numbers copied from the problem
    op_nums = 5

    key = jax.random.PRNGKey(0)
    kp, kd = jax.random.split(key)
    params = init_params(kp, H, op_nums, input_size)
    ks = jax.random.split(kd, 4)

    # glue replicating node_stacks / left_childs handling:
    #  batch 0: stack-top embedding present, left child is None
    #  batch 1: stack empty -> padding_hidden,  left child present
    padding_hidden = jnp.zeros((1, H), jnp.float32)
    stack_emb = jax.random.normal(ks[0], (1, H), jnp.float32)
    current_emb = jnp.concatenate([stack_emb, padding_hidden], axis=0)            # [B, H]
    left_child = jax.random.normal(ks[1], (1, H), jnp.float32)
    left = jnp.concatenate([jnp.zeros((1, H), jnp.float32), left_child], axis=0)  # [B, H]
    left_mask = jnp.array([[0.0], [1.0]], jnp.float32)                            # 1.0 => left child present

    encoder_outputs = jax.random.normal(ks[2], (S, B, H), jnp.float32)            # PyTorch [S, B, H]
    num_pades = jax.random.normal(ks[3], (B, num_size, H), jnp.float32)
    seq_mask = jnp.zeros((B, S), jnp.float32).at[1, 6:].set(1.0)
    mask_nums = jnp.zeros((B, input_size + num_size), jnp.float32).at[0, -1].set(1.0)

    packed = pack_weights(params)                                   # once per model
    enc_bf, smask_p = prepare_encoder(encoder_outputs, seq_mask)    # once per problem
    step = jax.jit(prediction_step)

    outs = step(packed, enc_bf, smask_p, current_emb, left, left_mask,
                num_pades, mask_nums)
    outs = jax.block_until_ready(outs)
    num_score, op, current_node, current_context, embedding_weight = outs

    ref_ns, ref_op, ref_node, ref_ctx = _reference(
        params, current_emb, left, left_mask, encoder_outputs,
        num_pades, seq_mask, mask_nums)

    assert num_score.shape == (B, input_size + num_size)
    assert op.shape == (B, op_nums)
    assert current_node.shape == (B, 1, H)
    assert current_context.shape == (B, 1, H)
    assert embedding_weight.shape == (B, input_size + num_size, H)

    # tolerance loosened vs f32 reference: weights/enc/emb are bf16 (f32 accumulate)
    # and the softmax denominator uses the EUP approximate reciprocal.
    tol = 3e-2
    assert jnp.allclose(num_score, ref_ns, rtol=tol, atol=tol)
    assert jnp.allclose(op, ref_op, rtol=tol, atol=tol)
    assert jnp.allclose(current_node[:, 0, :], ref_node, rtol=tol, atol=tol)
    assert jnp.allclose(current_context[:, 0, :], ref_ctx, rtol=tol, atol=tol)
    print("KERNEL_OK")
</pallas_src>

<mosaic_0001>
module attributes {stable_mosaic.version = 11 : i64} {
  func.func @_prediction_kernel(%arg0: i32, %arg1: memref<2x32xbf16, #tpu.memory_space<vmem>>, %arg2: memref<2x32xbf16, #tpu.memory_space<vmem>>, %arg3: memref<2x1xf32, #tpu.memory_space<vmem>>, %arg4: memref<2x8x32xbf16, #tpu.memory_space<vmem>>, %arg5: memref<2x8x32xbf16, #tpu.memory_space<vmem>>, %arg6: memref<2x8xf32, #tpu.memory_space<vmem>>, %arg7: memref<2x8xf32, #tpu.memory_space<vmem>>, %arg8: memref<64x128xbf16, #tpu.memory_space<vmem>>, %arg9: memref<1x128xf32, #tpu.memory_space<vmem>>, %arg10: memref<32x32xbf16, #tpu.memory_space<vmem>>, %arg11: memref<32x32xbf16, #tpu.memory_space<vmem>>, %arg12: memref<5x32xf32, #tpu.memory_space<vmem>>, %arg13: memref<64x37xbf16, #tpu.memory_space<vmem>>, %arg14: memref<1x37xf32, #tpu.memory_space<vmem>>, %arg15: memref<32x32xbf16, #tpu.memory_space<vmem>>, %arg16: memref<2x128xf32, #tpu.memory_space<vmem>>) attributes {dimension_semantics = [#tpu.dimension_semantics<parallel>], iteration_bounds = array<i64: 1>, scalar_prefetch = 0 : i64, scratch_operands = 0 : i64, tpu.core_type = #tpu.core_type<tc>, window_params = [{transform_indices = @transform_0, window_bounds = array<i64: 2, 32>}, {transform_indices = @transform_1, window_bounds = array<i64: 2, 32>}, {transform_indices = @transform_2, window_bounds = array<i64: 2, 1>}, {transform_indices = @transform_3, window_bounds = array<i64: 2, 8, 32>}, {transform_indices = @transform_4, window_bounds = array<i64: 2, 8, 32>}, {transform_indices = @transform_5, window_bounds = array<i64: 2, 8>}, {transform_indices = @transform_6, window_bounds = array<i64: 2, 8>}, {pipeline_mode = #tpu.pipeline_mode<synchronous>, transform_indices = @transform_7, window_bounds = array<i64: 64, 128>}, {pipeline_mode = #tpu.pipeline_mode<synchronous>, transform_indices = @transform_8, window_bounds = array<i64: 1, 128>}, {pipeline_mode = #tpu.pipeline_mode<synchronous>, transform_indices = @transform_9, window_bounds = array<i64: 32, 32>}, {pipeline_mode = #tpu.pipeline_mode<synchronous>, transform_indices = @transform_10, window_bounds = array<i64: 32, 32>}, {pipeline_mode = #tpu.pipeline_mode<synchronous>, transform_indices = @transform_11, window_bounds = array<i64: 5, 32>}, {pipeline_mode = #tpu.pipeline_mode<synchronous>, transform_indices = @transform_12, window_bounds = array<i64: 64, 37>}, {pipeline_mode = #tpu.pipeline_mode<synchronous>, transform_indices = @transform_13, window_bounds = array<i64: 1, 37>}, {pipeline_mode = #tpu.pipeline_mode<synchronous>, transform_indices = @transform_14, window_bounds = array<i64: 32, 32>}, {transform_indices = @transform_15, window_bounds = array<i64: 2, 128>}]} {
    %c0 = arith.constant 0 : index
    %c0_0 = arith.constant 0 : index
    %0 = vector.load %arg12[%c0, %c0_0] : memref<5x32xf32, #tpu.memory_space<vmem>>, vector<5x32xf32>
    %1 = vector.extract_strided_slice %0 {offsets = [0, 0], sizes = [1, 32], strides = [1, 1]} : vector<5x32xf32> to vector<1x32xf32>
    %2 = vector.extract_strided_slice %0 {offsets = [1, 0], sizes = [1, 32], strides = [1, 1]} : vector<5x32xf32> to vector<1x32xf32>
    %3 = vector.extract_strided_slice %0 {offsets = [2, 0], sizes = [1, 32], strides = [1, 1]} : vector<5x32xf32> to vector<1x32xf32>
    %4 = vector.extract_strided_slice %0 {offsets = [3, 0], sizes = [1, 32], strides = [1, 1]} : vector<5x32xf32> to vector<1x32xf32>
    %5 = vector.extract_strided_slice %0 {offsets = [4, 0], sizes = [1, 1], strides = [1, 1]} : vector<5x32xf32> to vector<1x1xf32>
    %c0_1 = arith.constant 0 : index
    %c0_2 = arith.constant 0 : index
    %6 = vector.load %arg2[%c0_1, %c0_2] : memref<2x32xbf16, #tpu.memory_space<vmem>>, vector<2x32xbf16>
    %c0_3 = arith.constant 0 : index
    %c0_4 = arith.constant 0 : index
    %7 = vector.load %arg1[%c0_3, %c0_4] : memref<2x32xbf16, #tpu.memory_space<vmem>>, vector<2x32xbf16>
    %8 = tpu.concatenate %6, %7 in 1 : vector<2x32xbf16>, vector<2x32xbf16> -> vector<2x64xbf16>
    %c0_5 = arith.constant 0 : index
    %c0_6 = arith.constant 0 : index
    %9 = vector.load %arg8[%c0_5, %c0_6] : memref<64x128xbf16, #tpu.memory_space<vmem>>, vector<64x128xbf16>
    %cst = arith.constant dense<0.000000e+00> : vector<2x128xf32>
    %10 = tpu.matmul %8, %9, %cst {dimension_numbers = #tpu.dot_dimension_numbers<[1], [0], [0], [1], [0, 0, 1, 1], [], []>} : vector<2x64xbf16>, vector<64x128xbf16>, vector<2x128xf32> -> vector<2x128xf32>
    %c0_7 = arith.constant 0 : index
    %c0_8 = arith.constant 0 : index
    %11 = vector.load %arg9[%c0_7, %c0_8] : memref<1x128xf32, #tpu.memory_space<vmem>>, vector<1x128xf32>
    %12 = vector.broadcast %11 : vector<1x128xf32> to vector<2x128xf32>
    %13 = arith.addf %10, %12 : vector<2x128xf32>
    %14 = vector.extract_strided_slice %13 {offsets = [0, 0], sizes = [2, 32], strides = [1, 1]} : vector<2x128xf32> to vector<2x32xf32>
    %15 = math.tanh %14 : vector<2x32xf32>
    %16 = vector.extract_strided_slice %13 {offsets = [0, 32], sizes = [2, 32], strides = [1, 1]} : vector<2x128xf32> to vector<2x32xf32>
    %17 = arith.negf %16 : vector<2x32xf32>
    %18 = math.exp %17 : vector<2x32xf32>
    %cst_9 = arith.constant 1.000000e+00 : f32
    %19 = vector.broadcast %cst_9 : f32 to vector<2x32xf32>
    %20 = arith.addf %19, %18 : vector<2x32xf32>
    %21 = arith.divf %19, %20 : vector<2x32xf32>
    %22 = vector.extract_strided_slice %13 {offsets = [0, 64], sizes = [2, 32], strides = [1, 1]} : vector<2x128xf32> to vector<2x32xf32>
    %23 = math.tanh %22 : vector<2x32xf32>
    %24 = vector.extract_strided_slice %13 {offsets = [0, 96], sizes = [2, 32], strides = [1, 1]} : vector<2x128xf32> to vector<2x32xf32>
    %25 = arith.negf %24 : vector<2x32xf32>
    %26 = math.exp %25 : vector<2x32xf32>
    %cst_10 = arith.constant 1.000000e+00 : f32
    %27 = vector.broadcast %cst_10 : f32 to vector<2x32xf32>
    %28 = arith.addf %27, %26 : vector<2x32xf32>
    %29 = arith.divf %27, %28 : vector<2x32xf32>
    %c0_11 = arith.constant 0 : index
    %c0_12 = arith.constant 0 : index
    %30 = vector.load %arg3[%c0_11, %c0_12] : memref<2x1xf32, #tpu.memory_space<vmem>>, vector<2x1xf32>
    %cst_13 = arith.constant 5.000000e-01 : f32
    %31 = vector.broadcast %cst_13 : f32 to vector<2x1xf32>
    %32 = arith.cmpf ogt, %30, %31 : vector<2x1xf32>
    %33 = arith.mulf %23, %29 : vector<2x32xf32>
    %34 = arith.mulf %15, %21 : vector<2x32xf32>
    %35 = vector.shape_cast %32 : vector<2x1xi1> to vector<2x1xi1>
    %36 = vector.broadcast %35 : vector<2x1xi1> to vector<2x32xi1>
    %37 = arith.select %36, %33, %34 : vector<2x32xi1>, vector<2x32xf32>
    %c0_14 = arith.constant 0 : index
    %c0_15 = arith.constant 0 : index
    %c0_16 = arith.constant 0 : index
    %38 = vector.load %arg4[%c0_14, %c0_15, %c0_16] : memref<2x8x32xbf16, #tpu.memory_space<vmem>>, vector<2x8x32xbf16>
    %39 = arith.truncf %37 : vector<2x32xf32> to vector<2x32xbf16>
    %c0_17 = arith.constant 0 : index
    %c0_18 = arith.constant 0 : index
    %40 = vector.load %arg10[%c0_17, %c0_18] : memref<32x32xbf16, #tpu.memory_space<vmem>>, vector<32x32xbf16>
    %cst_19 = arith.constant dense<0.000000e+00> : vector<2x32xf32>
    %41 = tpu.matmul %39, %40, %cst_19 {dimension_numbers = #tpu.dot_dimension_numbers<[1], [0], [0], [1], [0, 0, 1, 1], [], []>} : vector<2x32xbf16>, vector<32x32xbf16>, vector<2x32xf32> -> vector<2x32xf32>
    %42 = vector.shape_cast %38 : vector<2x8x32xbf16> to vector<16x32xbf16>
    %c0_20 = arith.constant 0 : index
    %c0_21 = arith.constant 0 : index
    %43 = vector.load %arg11[%c0_20, %c0_21] : memref<32x32xbf16, #tpu.memory_space<vmem>>, vector<32x32xbf16>
    %cst_22 = arith.constant dense<0.000000e+00> : vector<16x32xf32>
    %44 = tpu.matmul %42, %43, %cst_22 {dimension_numbers = #tpu.dot_dimension_numbers<[1], [0], [0], [1], [0, 0, 1, 1], [], []>} : vector<16x32xbf16>, vector<32x32xbf16>, vector<16x32xf32> -> vector<16x32xf32>
    %45 = vector.shape_cast %44 : vector<16x32xf32> to vector<2x8x32xf32>
    %46 = vector.shape_cast %41 : vector<2x32xf32> to vector<2x1x32xf32>
    %47 = vector.broadcast %46 : vector<2x1x32xf32> to vector<2x8x32xf32>
    %48 = arith.addf %47, %45 : vector<2x8x32xf32>
    %49 = vector.shape_cast %1 : vector<1x32xf32> to vector<1x1x32xf32>
    %50 = vector.broadcast %49 : vector<1x1x32xf32> to vector<2x8x32xf32>
    %51 = arith.addf %48, %50 : vector<2x8x32xf32>
    %52 = math.tanh %51 : vector<2x8x32xf32>
    %53 = vector.shape_cast %2 : vector<1x32xf32> to vector<1x1x32xf32>
    %54 = vector.broadcast %53 : vector<1x1x32xf32> to vector<2x8x32xf32>
    %55 = arith.mulf %52, %54 : vector<2x8x32xf32>
    %cst_23 = arith.constant dense<0.000000e+00> : vector<2x8xf32>
    %56 = vector.multi_reduction <add>, %55, %cst_23 [2] : vector<2x8x32xf32> to vector<2x8xf32>
    %57 = vector.broadcast %5 : vector<1x1xf32> to vector<2x8xf32>
    %58 = arith.addf %56, %57 : vector<2x8xf32>
    %c0_24 = arith.constant 0 : index
    %c0_25 = arith.constant 0 : index
    %59 = vector.load %arg6[%c0_24, %c0_25] : memref<2x8xf32, #tpu.memory_space<vmem>>, vector<2x8xf32>
    %cst_26 = arith.constant 5.000000e-01 : f32
    %60 = vector.broadcast %cst_26 : f32 to vector<2x8xf32>
    %61 = arith.cmpf ogt, %59, %60 : vector<2x8xf32>
    %cst_27 = arith.constant -9.99999995E+11 : f32
    %62 = vector.broadcast %cst_27 : f32 to vector<2x8xf32>
    %63 = arith.select %61, %62, %58 : vector<2x8xi1>, vector<2x8xf32>
    %cst_28 = arith.constant dense<0xFF800000> : vector<2xf32>
    %64 = vector.multi_reduction <maximumf>, %63, %cst_28 [1] : vector<2x8xf32> to vector<2xf32>
    %65 = vector.shape_cast %64 : vector<2xf32> to vector<2x1xf32>
    %66 = vector.broadcast %65 : vector<2x1xf32> to vector<2x8xf32>
    %67 = arith.subf %63, %66 : vector<2x8xf32>
    %68 = math.exp %67 : vector<2x8xf32>
    %cst_29 = arith.constant dense<0.000000e+00> : vector<2xf32>
    %69 = vector.multi_reduction <add>, %68, %cst_29 [1] : vector<2x8xf32> to vector<2xf32>
    %70 = vector.shape_cast %69 : vector<2xf32> to vector<2x1xf32>
    %71 = tpu.reciprocal %70 {approx = true} : vector<2x1xf32> -> vector<2x1xf32>
    %72 = vector.broadcast %71 : vector<2x1xf32> to vector<2x8xf32>
    %73 = arith.mulf %68, %72 : vector<2x8xf32>
    %74 = vector.shape_cast %73 : vector<2x8xf32> to vector<2x8x1xf32>
    %75 = arith.extf %38 : vector<2x8x32xbf16> to vector<2x8x32xf32>
    %76 = vector.broadcast %74 : vector<2x8x1xf32> to vector<2x8x32xf32>
    %77 = arith.mulf %76, %75 : vector<2x8x32xf32>
    %cst_30 = arith.constant dense<0.000000e+00> : vector<2x32xf32>
    %78 = vector.multi_reduction <add>, %77, %cst_30 [1] : vector<2x8x32xf32> to vector<2x32xf32>
    %79 = tpu.concatenate %37, %78 in 1 : vector<2x32xf32>, vector<2x32xf32> -> vector<2x64xf32>
    %80 = arith.truncf %79 : vector<2x64xf32> to vector<2x64xbf16>
    %c0_31 = arith.constant 0 : index
    %c0_32 = arith.constant 0 : index
    %81 = vector.load %arg13[%c0_31, %c0_32] : memref<64x37xbf16, #tpu.memory_space<vmem>>, vector<64x37xbf16>
    %cst_33 = arith.constant dense<0.000000e+00> : vector<2x37xf32>
    %82 = tpu.matmul %80, %81, %cst_33 {dimension_numbers = #tpu.dot_dimension_numbers<[1], [0], [0], [1], [0, 0, 1, 1], [], []>} : vector<2x64xbf16>, vector<64x37xbf16>, vector<2x37xf32> -> vector<2x37xf32>
    %c0_34 = arith.constant 0 : index
    %c0_35 = arith.constant 0 : index
    %83 = vector.load %arg14[%c0_34, %c0_35] : memref<1x37xf32, #tpu.memory_space<vmem>>, vector<1x37xf32>
    %84 = vector.broadcast %83 : vector<1x37xf32> to vector<2x37xf32>
    %85 = arith.addf %82, %84 : vector<2x37xf32>
    %86 = vector.extract_strided_slice %85 {offsets = [0, 0], sizes = [2, 32], strides = [1, 1]} : vector<2x37xf32> to vector<2x32xf32>
    %87 = vector.extract_strided_slice %85 {offsets = [0, 32], sizes = [2, 5], strides = [1, 1]} : vector<2x37xf32> to vector<2x5xf32>
    %c0_36 = arith.constant 0 : index
    %c0_37 = arith.constant 0 : index
    %c0_38 = arith.constant 0 : index
    %88 = vector.load %arg5[%c0_36, %c0_37, %c0_38] : memref<2x8x32xbf16, #tpu.memory_space<vmem>>, vector<2x8x32xbf16>
    %89 = vector.shape_cast %88 : vector<2x8x32xbf16> to vector<16x32xbf16>
    %c0_39 = arith.constant 0 : index
    %c0_40 = arith.constant 0 : index
    %90 = vector.load %arg15[%c0_39, %c0_40] : memref<32x32xbf16, #tpu.memory_space<vmem>>, vector<32x32xbf16>
    %cst_41 = arith.constant dense<0.000000e+00> : vector<16x32xf32>
    %91 = tpu.matmul %89, %90, %cst_41 {dimension_numbers = #tpu.dot_dimension_numbers<[1], [0], [0], [1], [0, 0, 1, 1], [], []>} : vector<16x32xbf16>, vector<32x32xbf16>, vector<16x32xf32> -> vector<16x32xf32>
    %92 = vector.shape_cast %91 : vector<16x32xf32> to vector<2x8x32xf32>
    %93 = vector.shape_cast %86 : vector<2x32xf32> to vector<2x1x32xf32>
    %94 = vector.broadcast %93 : vector<2x1x32xf32> to vector<2x8x32xf32>
    %95 = arith.addf %94, %92 : vector<2x8x32xf32>
    %96 = vector.shape_cast %3 : vector<1x32xf32> to vector<1x1x32xf32>
    %97 = vector.broadcast %96 : vector<1x1x32xf32> to vector<2x8x32xf32>
    %98 = arith.addf %95, %97 : vector<2x8x32xf32>
    %99 = math.tanh %98 : vector<2x8x32xf32>
    %100 = vector.shape_cast %4 : vector<1x32xf32> to vector<1x1x32xf32>
    %101 = vector.broadcast %100 : vector<1x1x32xf32> to vector<2x8x32xf32>
    %102 = arith.mulf %99, %101 : vector<2x8x32xf32>
    %cst_42 = arith.constant dense<0.000000e+00> : vector<2x8xf32>
    %103 = vector.multi_reduction <add>, %102, %cst_42 [2] : vector<2x8x32xf32> to vector<2x8xf32>
    %c0_43 = arith.constant 0 : index
    %c0_44 = arith.constant 0 : index
    %104 = vector.load %arg7[%c0_43, %c0_44] : memref<2x8xf32, #tpu.memory_space<vmem>>, vector<2x8xf32>
    %cst_45 = arith.constant 5.000000e-01 : f32
    %105 = vector.broadcast %cst_45 : f32 to vector<2x8xf32>
    %106 = arith.cmpf ogt, %104, %105 : vector<2x8xf32>
    %cst_46 = arith.constant -9.99999995E+11 : f32
    %107 = vector.broadcast %cst_46 : f32 to vector<2x8xf32>
    %108 = arith.select %106, %107, %103 : vector<2x8xi1>, vector<2x8xf32>
    %cst_47 = arith.constant 0.000000e+00 : f32
    %109 = vector.broadcast %cst_47 : f32 to vector<2x51xf32>
    %110 = tpu.concatenate %108, %87, %37, %78, %109 in 1 : vector<2x8xf32>, vector<2x5xf32>, vector<2x32xf32>, vector<2x32xf32>, vector<2x51xf32> -> vector<2x128xf32>
    %c0_48 = arith.constant 0 : index
    %c0_49 = arith.constant 0 : index
    %111 = vector.load %arg16[%c0_48, %c0_49] : memref<2x128xf32, #tpu.memory_space<vmem>>, vector<2x128xf32>
    tpu.vector_store %arg16[%c0_48, %c0_49], %110 {strides = array<i32>} : memref<2x128xf32, #tpu.memory_space<vmem>>, vector<2x128xf32>,
    return
  }
  func.func @transform_0(%arg0: i32) -> (i32, i32) {
    %c0_i32 = arith.constant 0 : i32
    %c0_i32_0 = arith.constant 0 : i32
    return %arg0, %c0_i32 : i32, i32
  }
  func.func @transform_1(%arg0: i32) -> (i32, i32) {
    %c0_i32 = arith.constant 0 : i32
    %c0_i32_0 = arith.constant 0 : i32
    return %arg0, %c0_i32 : i32, i32
  }
  func.func @transform_2(%arg0: i32) -> (i32, i32) {
    %c0_i32 = arith.constant 0 : i32
    %c0_i32_0 = arith.constant 0 : i32
    return %arg0, %c0_i32 : i32, i32
  }
  func.func @transform_3(%arg0: i32) -> (i32, i32, i32) {
    %c0_i32 = arith.constant 0 : i32
    %c0_i32_0 = arith.constant 0 : i32
    %c0_i32_1 = arith.constant 0 : i32
    return %arg0, %c0_i32, %c0_i32_0 : i32, i32, i32
  }
  func.func @transform_4(%arg0: i32) -> (i32, i32, i32) {
    %c0_i32 = arith.constant 0 : i32
    %c0_i32_0 = arith.constant 0 : i32
    %c0_i32_1 = arith.constant 0 : i32
    return %arg0, %c0_i32, %c0_i32_0 : i32, i32, i32
  }
  func.func @transform_5(%arg0: i32) -> (i32, i32) {
    %c0_i32 = arith.constant 0 : i32
    %c0_i32_0 = arith.constant 0 : i32
    return %arg0, %c0_i32 : i32, i32
  }
  func.func @transform_6(%arg0: i32) -> (i32, i32) {
    %c0_i32 = arith.constant 0 : i32
    %c0_i32_0 = arith.constant 0 : i32
    return %arg0, %c0_i32 : i32, i32
  }
  func.func @transform_7(%arg0: i32) -> (i32, i32) {
    %c0_i32 = arith.constant 0 : i32
    %c0_i32_0 = arith.constant 0 : i32
    %c0_i32_1 = arith.constant 0 : i32
    return %c0_i32, %c0_i32_0 : i32, i32
  }
  func.func @transform_8(%arg0: i32) -> (i32, i32) {
    %c0_i32 = arith.constant 0 : i32
    %c0_i32_0 = arith.constant 0 : i32
    %c0_i32_1 = arith.constant 0 : i32
    return %c0_i32, %c0_i32_0 : i32, i32
  }
  func.func @transform_9(%arg0: i32) -> (i32, i32) {
    %c0_i32 = arith.constant 0 : i32
    %c0_i32_0 = arith.constant 0 : i32
    %c0_i32_1 = arith.constant 0 : i32
    return %c0_i32, %c0_i32_0 : i32, i32
  }
  func.func @transform_10(%arg0: i32) -> (i32, i32) {
    %c0_i32 = arith.constant 0 : i32
    %c0_i32_0 = arith.constant 0 : i32
    %c0_i32_1 = arith.constant 0 : i32
    return %c0_i32, %c0_i32_0 : i32, i32
  }
  func.func @transform_11(%arg0: i32) -> (i32, i32) {
    %c0_i32 = arith.constant 0 : i32
    %c0_i32_0 = arith.constant 0 : i32
    %c0_i32_1 = arith.constant 0 : i32
    return %c0_i32, %c0_i32_0 : i32, i32
  }
  func.func @transform_12(%arg0: i32) -> (i32, i32) {
    %c0_i32 = arith.constant 0 : i32
    %c0_i32_0 = arith.constant 0 : i32
    %c0_i32_1 = arith.constant 0 : i32
    return %c0_i32, %c0_i32_0 : i32, i32
  }
  func.func @transform_13(%arg0: i32) -> (i32, i32) {
    %c0_i32 = arith.constant 0 : i32
    %c0_i32_0 = arith.constant 0 : i32
    %c0_i32_1 = arith.constant 0 : i32
    return %c0_i32, %c0_i32_0 : i32, i32
  }
  func.func @transform_14(%arg0: i32) -> (i32, i32) {
    %c0_i32 = arith.constant 0 : i32
    %c0_i32_0 = arith.constant 0 : i32
    %c0_i32_1 = arith.constant 0 : i32
    return %c0_i32, %c0_i32_0 : i32, i32
  }
  func.func @transform_15(%arg0: i32) -> (i32, i32) {
    %c0_i32 = arith.constant 0 : i32
    %c0_i32_0 = arith.constant 0 : i32
    return %arg0, %c0_i32 : i32, i32
  }
}

</mosaic_0001>

<bundles_post_ra>
// kernel: prediction_step.1
= control target key start
LH: loop header
LB: loop body
LE: loop exit
PB: predicated region body
PF: predicated region fallthrough
CT: control target
= control target key end

     0   :  { %v65_v0 = vlaneseq  ;;  %v829_v1 = vmov 1966171168   ;;  %v830_v3 = vmov 0.0   ;;  %vm831_vm0 = vmmov 0   ;;  %s832_s25 = smov 32   ;;  %s835_s20 = smov 64   ;;  %s1090_s0 = inlined_call_operand.vmem [shape: bf16[2,32], index: 0, kind: input, shape index: {}]   ;;  %s1091_s7 = inlined_call_operand.vmem [shape: bf16[64,128], index: 7, kind: input, shape index: {}]   ;;  %s1092_s1 = inlined_call_operand.vmem [shape: bf16[2,32], index: 1, kind: input, shape index: {}]   ;;  %s1093_s2 = inlined_call_operand.vmem [shape: f32[2,1], index: 2, kind: input, shape index: {}]   ;;  %s1094_s8 = inlined_call_operand.vmem [shape: f32[1,128], index: 8, kind: input, shape index: {}]   ;;  %s1095_s9 = inlined_call_operand.vmem [shape: bf16[32,32], index: 9, kind: input, shape index: {}]   ;;  %s1096_s10 = inlined_call_operand.vmem [shape: bf16[32,32], index: 10, kind: input, shape index: {}]   ;;  %s1097_s3 = inlined_call_operand.vmem [shape: bf16[2,8,32], index: 3, kind: input, shape index: {}]   ;;  %s1098_s11 = inlined_call_operand.vmem [shape: f32[5,32], index: 11, kind: input, shape index: {}]   ;;  %s1099_s5 = inlined_call_operand.vmem [shape: f32[2,8], index: 5, kind: input, shape index: {}]   ;;  %s1100_s12 = inlined_call_operand.vmem [shape: bf16[64,37], index: 12, kind: input, shape index: {}]   ;;  %s1101_s14 = inlined_call_operand.vmem [shape: bf16[32,32], index: 14, kind: input, shape index: {}]   ;;  %s1102_s4 = inlined_call_operand.vmem [shape: bf16[2,8,32], index: 4, kind: input, shape index: {}]   ;;  %s1103_s13 = inlined_call_operand.vmem [shape: f32[1,37], index: 13, kind: input, shape index: {}]   ;;  %s1104_s6 = inlined_call_operand.vmem [shape: f32[2,8], index: 6, kind: input, shape index: {}]   ;;  %s1105_s15 = inlined_call_operand.vmem [shape: f32[2,128], index: 15, kind: output, shape index: {}]  }
   0x1   :  { %v63_v2 = vunpack.c.l.s4 %v829_v1  ;;  %732 = vmatprep.subr.bf16.mxu0 %v830_v3  ;;  %744 = vmatprep.subr.bf16.mxu1 %v830_v3  ;;  %v688_v4 = vld.sshfl [vmem:[%s1090_s0] sm:$0x1 pattern:$0x75316420]  ;;  %v795_v8 = vld [vmem:[%s1091_s7 + $0x8] sm:$0xff]   ;;  %v796_v11 = vld [vmem:[%s1091_s7 + $0x10] sm:$0xff]  }
   0x2   :  { %v925_v5 = vshrl.u32 %v65_v0, 7  ;;  %v794_v6 = vld [vmem:[%s1091_s7] sm:$0xff]   ;;  %740 = vmatprep.mubr.msk.bf16.mxu0 %vm831_vm0, %v830_v3  ;;  %748 = vmatprep.mubr.msk.bf16.mxu1 %vm831_vm0, %v830_v3  ;;  %v797_v12 = vld [vmem:[%s1091_s7 + $0x18] sm:$0xff]   ;;  %vm71_vm1 = vcmask 261120   ;;  %vm114_vm2 = vcmask 523264   ;;  %v833_v16 = vmov 0  }
   0x3   :  { %v64_v7 = vunpack.c.0.s8 %v63_v2  ;;  %733 = vmatpush3.bf16.msra.mxu0 %v794_v6  ;;  %v52_v13 = vld [vmem:[%s1092_s1] sm:$0x1]  ;;  %792 = vset.pattern.permute.xlu1 %v833_v16  ;;  %v799_v30 = vld [vmem:[%s1095_s9 + $0x8] sm:$0xff]   ;;  %vm387_vm5 = vcmask 1041409   ;;  %vm391_vm7 = vcmask 58368   ;;  %vm675_vm9 = vcmask 64512  }
   0x4   :  { %734 = vmatprep.subr.bf16.mxu0 %v830_v3  ;;  %v164_v17 = vld [vmem:[%s1093_s2] sm:$0x3]  ;;  %793 = vset.pattern.permute.xlu0 %v833_v16  ;;  %s834_s2 = smov 96   ;;  %v801_v40 = vld [vmem:[%s1096_s10 + $0x8] sm:$0xff]   ;;  %v1008_v51 = vsub.s32 0, %v925_v5  ;;  %v356_v1 = vsub.s32 1, %v925_v5 }
   0x5   :  { %v936_v9 = vsub.s32 %v64_v7, %v925_v5  ;;  %vm165_vm3 = vcmp.gt.f32.partialorder %v164_v17, 0.5  ;;  %v689_v19 = vld [vmem:[%s1094_s8] ss:$0 sm:$0xff]  ;;  %vm677_vm10 = vcmask 105472   ;;  %vm679_vm11 = vcmask 367616  }
   0x6   :  { %v171_v18 = vsel %vm165_vm3, 1, %v833_v16  ;;  %v798_v29 = vld [vmem:[%s1095_s9] sm:$0xff]   ;;  %s838_s9 = smov 104   ;;  %vm681_vm12 = vcmask 629760  }
   0x7   :  { %v68_v10 = vrot.slane %v688_v4, %v936_v9  ;;  %735 = vmatpush3.bf16.msra.mxu0 %v795_v8  ;;  %173 = vperm.xlu1 %792, %v171_v18   ;;  %v800_v38 = vld [vmem:[%s1096_s10] sm:$0xff]  }
   0x8   :  { %736 = vmatprep.subr.bf16.mxu0 %v830_v3  ;;  %745 = vmatpush3.bf16.msra.mxu1 %v798_v29  ;;  %v991_v41 = vld [vmem:[%s1097_s3] sm:$0xff]  }
   0x9   :  { %69 = vrot.lane.b32.xlu0 %v68_v10, %s832_s25  ;;  %746 = vmatprep.subr.bf16.mxu1 %v830_v3  ;;  %v1002_v42 = vld [vmem:[%s1098_s11] sm:$0x1f] }
   0xa   :  { %v367_v43 = vrot.slane %v1002_v42, 4  ;;  %v349_v54 = vrot.slane %v1002_v42, %v1008_v51  ;;  %v357_v2 = vrot.slane %v1002_v42, %v356_v1  ;;  %v373_v18 = vld [vmem:[%s1099_s5] sm:$0x3] }
   0xb   :  { %737 = vmatpush3.bf16.msra.mxu0 %v796_v11  ;;  %vm374_vm6 = vcmp.gt.f32.partialorder %v373_v18, 0.5 }
   0xc   :  { %738 = vmatprep.subr.bf16.mxu0 %v830_v3  ;;  %747 = vmatpush3.bf16.msra.mxu1 %v799_v30  ;;  %780 = vpush %v367_v43 }
   0xd   :  { %752 = vmatprep.subr.bf16.mxu1 %v830_v3 }
   0xf   :  { %739 = vmatpush3.bf16.msra.mxu0 %v797_v12  ;;  %v378_v12 = vand.u32 127, %v65_v0 }
  0x10   :  { %760 = vmatprep.subr.bf16.mxu0 %v830_v3 }
  0x3d   :  { %s781_s3 = spop %780 }
  0x7b   :  { %v70_v14 = vpop.permute.xlu0 %69 }
  0x7c   :  { %v74_v15 = vsel %vm71_vm1, %v52_v13, %v70_v14  ;;  %v369_v13 = vstv %s781_s3 }
  0x7d   :  { %741 = vmatmul.mubr.msk.bf16.vlgmr.msra.gmra.mrb[0].mxu0 %vm114_vm2, %v74_v15  ;;  %v1021_v15 = vsub.s32 %v378_v12, %v925_v5  ;;  %v703_v12 = vld [vmem:[%s1103_s13] ss:$0 sm:$0xff]  ;;  %s836_s13 = smov 77  }
  0x7e   :  { %768 = vmatprep.mubr.msk.bf16.mxu0 %vm831_vm0, %v830_v3 }
  0x86   :  { %v174_v34 = vpop.permute.xlu1 %173 }
  0x87   :  { %vm175_vm4 = vcmp.eq.s32.totalorder %v174_v34, 1  ;;  %v803_v34 = vld [vmem:[%s1100_s12] sm:$0xff]  }
  0x88   :  { %761 = vmatpush3.bf16.msra.mxu0 %v803_v34 }
  0x89   :  { %762 = vmatprep.subr.bf16.mxu0 %v830_v3 }
 0x150   :  { %v151_v20 = vpop.f32.mrb[0].mxu0 }
 0x151   :  { %v152_v21 = vadd.f32 %v689_v19, %v151_v20  ;;  %v742_v22 = vpop.f32.mrb[1].mxu0 }
 0x152   :  { %v154_v23 = vpop.f32.mrb[2].mxu0 }
 0x153   :  { %v695_v24 = vmul.f32 -1.442695, %v152_v21  ;;  %v743_v25 = vpop.f32.mrb[3].mxu0 }
 0x155   :  { %811 = vpow2.f32 %v695_v24 }
 0x15f   :  { %v812_v26 = vpop.eup %811 }
 0x160   :  { %v161_v27 = vadd.f32 1.0, %v812_v26 }
 0x162   :  { %813 = vrcp.f32 %v161_v27 }
 0x163   :  { %815 = vtanh.f32 %v152_v21 }
 0x16c   :  { %v814_v28 = vpop.eup %813 }
 0x16d   :  { %167 = vrot.lane.b32.xlu0 %v814_v28, %s834_s2  ;;  %v816_v31 = vpop.eup %815 }
 0x1df   :  { %v168_v32 = vpop.permute.xlu0 %167 }
 0x1e0   :  { %v170_v33 = vmul.f32 %v816_v31, %v168_v32 }
 0x1e2   :  { %177 = vrot.lane.b32.xlu1 %v170_v33, %s835_s20 }
 0x254   :  { %v178_v35 = vpop.permute.xlu1 %177 }
 0x255   :  { %v974_v36 = vsel %vm175_vm4, %v170_v33, %v178_v35  ;;  %v804_v35 = vld [vmem:[%s1100_s12 + $0x8] sm:$0xff]  }
 0x256   :  { %v183_v37 = vpack.c.bf16 %v974_v36, %v974_v36  ;;  %763 = vmatpush3.bf16.msra.mxu0 %v804_v35 }
 0x257   :  { %764 = vmatprep.subr.bf16.mxu0 %v830_v3 }
 0x258   :  { %189 = vrot.lane.b32.xlu0 %v183_v37, %s835_s20  ;;  %v805_v37 = vld [vmem:[%s1100_s12 + $0x10] sm:$0xff]  }
 0x25a   :  { %765 = vmatpush3.bf16.msra.mxu0 %v805_v37 }
 0x25b   :  { %766 = vmatprep.subr.bf16.mxu0 %v830_v3 }
 0x2ca   :  { %v190_v39 = vpop.permute.xlu0 %189 }
 0x2cb   :  { %749 = vmatmul.mubr.msk.bf16.vlgmr.msra.gmra.mrb[0].mxu1 %vm71_vm1, %v190_v39  ;;  %v417_v39 = vunpack.c.l.bf16 %v991_v41 }
 0x2cc   :  { %753 = vmatpush3.bf16.msra.mxu1 %v800_v38  ;;  %756 = vmatprep.mubr.msk.bf16.mxu1 %vm831_vm0, %v830_v3  ;;  %v418_v38 = vunpack.c.h.bf16 %v991_v41 }
 0x2cd   :  { %754 = vmatprep.subr.bf16.mxu1 %v830_v3 }
 0x2d0   :  { %755 = vmatpush3.bf16.msra.mxu1 %v801_v40 }
 0x2d1   :  { %772 = vmatprep.subr.bf16.mxu1 %v830_v3 }
 0x2d3   :  { %757 = vmatmul.mubr.msk.bf16.vlgmr.msra.gmra.mrb[4].mxu1 %vm71_vm1, %v991_v41 }
 0x2d4   :  { %776 = vmatprep.mubr.msk.bf16.mxu1 %vm831_vm0, %v830_v3 }
 0x39e   :  { %v240_v44 = vpop.f32.mrb[0].mxu1 }
 0x39f   :  { %v318_v45 = vrot.slane %v240_v44, %v936_v9  ;;  %v750_v46 = vpop.f32.mrb[1].mxu1 }
 0x3a0   :  { %v243_v47 = vpop.f32.mrb[2].mxu1  ;;  %v806_v46 = vld [vmem:[%s1100_s12 + $0x18] sm:$0xff]  }
 0x3a1   :  { %v319_v48 = vcombine.high %v318_v45, %v318_v45  ;;  %v326_v49 = vrot.slane %v318_v45, %v936_v9  ;;  %v751_v50 = vpop.f32.mrb[3].mxu1  ;;  %767 = vmatpush3.bf16.msra.mxu0 %v806_v46 }
 0x3a3   :  { %v333_v52 = vrot.slane %v319_v48, %v936_v9  ;;  %v337_v53 = vrot.slane %v326_v49, %v1008_v51 }
 0x3a5   :  { %v341_v58 = vrot.slane %v333_v52, %v1008_v51  ;;  %v807_v52 = vld [vmem:[%s1101_s14] sm:$0xff]  }
 0x3a6   :  { %v304_v55 = vpop.f32.mrb[4].mxu1  ;;  %773 = vmatpush3.bf16.msra.mxu1 %v807_v52 }
 0x3a7   :  { %v344_v56 = vadd.f32 %v337_v53, %v304_v55  ;;  %v758_v57 = vpop.f32.mrb[5].mxu1  ;;  %774 = vmatprep.subr.bf16.mxu1 %v830_v3 }
 0x3a8   :  { %v307_v59 = vpop.f32.mrb[6].mxu1  ;;  %v809_v57 = vld [vmem:[%s1102_s4] sm:$0xff]  }
 0x3a9   :  { %v350_v60 = vadd.f32 %v349_v54, %v344_v56  ;;  %v345_v61 = vadd.f32 %v341_v58, %v307_v59  ;;  %v759_v62 = vpop.f32.mrb[7].mxu1 }
 0x3ab   :  { %817 = vtanh.f32 %v350_v60  ;;  %v351_v63 = vadd.f32 %v349_v54, %v345_v61  ;;  %v808_v54 = vld [vmem:[%s1101_s14 + $0x8] sm:$0xff]  }
 0x3ac   :  { %775 = vmatpush3.bf16.msra.mxu1 %v808_v54 }
 0x3ad   :  { %819 = vtanh.f32 %v351_v63 }
 0x3af   :  { %777 = vmatmul.mubr.msk.bf16.vlgmr.msra.gmra.mrb[8].mxu1 %vm71_vm1, %v809_v57 }
 0x3b5   :  { %v818_v4 = vpop.eup %817 }
 0x3b6   :  { %v358_v6 = vmul.f32 %v818_v4, %v357_v2 }
 0x3b7   :  { %v820_v7 = vpop.eup %819 }
 0x3b8   :  { %v360_v8 = vsel %vm71_vm1, %v358_v6, 0.0  ;;  %v359_v10 = vmul.f32 %v820_v7, %v357_v2 }
 0x3b9   :  { %361 = vadd.xlane.f32.xlu1 %v360_v8 }
 0x3ba   :  { %v363_v11 = vsel %vm71_vm1, %v359_v10, 0.0 }
 0x3bb   :  { %364 = vadd.xlane.f32.xlu0 %v363_v11 }
 0x446   :  { %v362_v14 = vpop.xlane.xlu1 %361 }
 0x447   :  { %v371_v16 = vadd.f32 %v369_v13, %v362_v14 }
 0x448   :  { %v365_v17 = vpop.xlane.xlu0 %364 }
 0x449   :  { %v372_v19 = vadd.f32 %v369_v13, %v365_v17  ;;  %v382_v20 = vrot.slane %v371_v16, %v1021_v15 }
 0x44b   :  { %v386_v21 = vrot.slane %v372_v19, %v1021_v15 }
 0x44d   :  { %v388_v0 = vsel %vm387_vm5, %v386_v21, %v382_v20  ;;  %v633_v20 = vsub.s32 2, %v925_v5 }
 0x44e   :  { %v390_v22 = vsel %vm374_vm6, -1e+12, %v388_v0 }
 0x44f   :  { %v392_v23 = vsel %vm391_vm7, %v390_v22, -inf }
 0x450   :  { %393 = vmax.xlane.f32.xlu0 %v392_v23  ;;  %v634_v23 = vrot.slane %v1002_v42, %v633_v20 }
 0x482   :  { %v589_v7 = vpop.f32.mrb[8].mxu1 }
 0x483   :  { %v778_v8 = vpop.f32.mrb[9].mxu1 }
 0x484   :  { %v592_v10 = vpop.f32.mrb[10].mxu1 }
 0x485   :  { %v779_v11 = vpop.f32.mrb[11].mxu1 }
 0x4dd   :  { %v394_v24 = vpop.xlane.xlu0 %393 }
 0x4de   :  { %v395_v25 = vsub.f32 %v390_v22, %v394_v24 }
 0x4e0   :  { %v396_v26 = vmul.f32 1.442695, %v395_v25 }
 0x4e2   :  { %821 = vpow2.f32 %v396_v26 }
 0x4ec   :  { %v822_v27 = vpop.eup %821 }
 0x4ed   :  { %v398_v28 = vsel %vm391_vm7, %v822_v27, 0.0 }
 0x4ee   :  { %399 = vadd.xlane.f32.xlu1 %v398_v28 }
 0x57b   :  { %v400_v29 = vpop.xlane.xlu1 %399 }
 0x57c   :  { %823 = vrcp.f32 %v400_v29 }
 0x586   :  { %v824_v30 = vpop.eup %823 }
 0x587   :  { %v402_v31 = vmul.f32 %v824_v30, %v822_v27  ;;  %v641_v30 = vsub.s32 3, %v925_v5 }
 0x589   :  { %v413_v32 = vrot.slane %v402_v31, %v356_v1  ;;  %v406_v33 = vrot.slane %v402_v31, %v1008_v51  ;;  %v642_v31 = vrot.slane %v1002_v42, %v641_v30  ;;  %v651_v42 = vld [vmem:[%s1104_s6] sm:$0x3] }
 0x58a   :  { %vm652_vm8 = vcmp.gt.f32.partialorder %v651_v42, 0.5 }
 0x58b   :  { %415 = vbcast.lane.b32.xlu1 %v413_v32, 256  ;;  %408 = vbcast.lane.b32.xlu0 %v406_v33, 256 }
 0x58f   :  { %436 = vrot.lane.b32.xlu1 %v974_v36, %s835_s20 }
 0x5fd   :  { %v416_v40 = vpop.permute.xlu1 %415  ;;  %v409_v43 = vpop.permute.xlu0 %408 }
 0x5fe   :  { %v420_v44 = vmul.f32 %v418_v38, %v416_v40  ;;  %v419_v45 = vmul.f32 %v417_v39, %v409_v43 }
 0x600   :  { %v428_v47 = vsel %vm71_vm1, %v420_v44, 0.0  ;;  %v421_v48 = vsel %vm71_vm1, %v419_v45, 0.0 }
 0x601   :  { %v429_v49 = vrot.slane %v428_v47, 4  ;;  %v422_v50 = vrot.slane %v421_v48, 4  ;;  %v437_v1 = vpop.permute.xlu1 %436 }
 0x603   :  { %v430_v41 = vadd.f32 %v429_v49, %v428_v47  ;;  %v423_v53 = vadd.f32 %v422_v50, %v421_v48 }
 0x605   :  { %v431_v55 = vrot.slane %v430_v41, 2  ;;  %v424_v56 = vrot.slane %v423_v53, 2 }
 0x607   :  { %v432_v58 = vadd.f32 %v431_v55, %v430_v41  ;;  %v425_v59 = vadd.f32 %v424_v56, %v423_v53 }
 0x609   :  { %v433_v60 = vrot.slane %v432_v58, 1  ;;  %v426_v61 = vrot.slane %v425_v59, 1 }
 0x60b   :  { %v427_v62 = vadd.f32 %v426_v61, %v425_v59  ;;  %v434_v63 = vadd.f32 %v433_v60, %v432_v58 }
 0x60d   :  { %v441_v3 = vsel %vm387_vm5, %v434_v63, %v427_v62 }
 0x60e   :  { %442 = vrot.lane.b32.xlu0 %v441_v3, %s832_s25  ;;  %s837_s25 = smov 45  }
 0x680   :  { %v443_v2 = vpop.permute.xlu0 %442 }
 0x681   :  { %v445_v4 = vsel %vm71_vm1, %v437_v1, %v443_v2 }
 0x682   :  { %v446_v6 = vpack.c.bf16 %v445_v4, %v445_v4 }
 0x684   :  { %769 = vmatmul.mubr.msk.bf16.vlgmr.msra.gmra.mrb[4].mxu0 %vm114_vm2, %v446_v6 }
 0x757   :  { %v523_v13 = vpop.f32.mrb[4].mxu0 }
 0x758   :  { %v524_v14 = vadd.f32 %v703_v12, %v523_v13  ;;  %v770_v16 = vpop.f32.mrb[5].mxu0 }
 0x759   :  { %v526_v17 = vpop.f32.mrb[6].mxu0 }
 0x75a   :  { %v603_v18 = vrot.slane %v524_v14, %v936_v9  ;;  %v771_v19 = vpop.f32.mrb[7].mxu0 }
 0x75c   :  { %v604_v21 = vcombine.high %v603_v18, %v603_v18  ;;  %v611_v0 = vrot.slane %v603_v18, %v936_v9 }
 0x75e   :  { %v622_v22 = vrot.slane %v611_v0, %v1008_v51  ;;  %v618_v24 = vrot.slane %v604_v21, %v936_v9 }
 0x760   :  { %v629_v25 = vadd.f32 %v622_v22, %v589_v7  ;;  %v626_v26 = vrot.slane %v618_v24, %v1008_v51 }
 0x762   :  { %v635_v27 = vadd.f32 %v634_v23, %v629_v25  ;;  %v630_v28 = vadd.f32 %v626_v26, %v592_v10 }
 0x764   :  { %825 = vtanh.f32 %v635_v27  ;;  %v636_v29 = vadd.f32 %v634_v23, %v630_v28 }
 0x766   :  { %827 = vtanh.f32 %v636_v29 }
 0x76e   :  { %v826_v32 = vpop.eup %825 }
 0x76f   :  { %v643_v33 = vmul.f32 %v826_v32, %v642_v31 }
 0x770   :  { %v828_v34 = vpop.eup %827 }
 0x771   :  { %v645_v35 = vsel %vm71_vm1, %v643_v33, 0.0  ;;  %v644_v37 = vmul.f32 %v828_v34, %v642_v31 }
 0x772   :  { %646 = vadd.xlane.f32.xlu1 %v645_v35 }
 0x773   :  { %v648_v9 = vsel %vm71_vm1, %v644_v37, 0.0 }
 0x774   :  { %649 = vadd.xlane.f32.xlu0 %v648_v9 }
 0x783   :  { %669 = vrot.lane.b32.xlu1 %v974_v36, %s836_s13 }
 0x787   :  { %672 = vrot.lane.b32.xlu1 %v441_v3, %s837_s25 }
 0x78a   :  { %666 = vrot.lane.b32.xlu0 %v524_v14, %s838_s9 }
 0x7ff   :  { %v647_v5 = vpop.xlane.xlu1 %646 }
 0x800   :  { %v658_v38 = vrot.slane %v647_v5, %v1021_v15 }
 0x801   :  { %v650_v51 = vpop.xlane.xlu0 %649 }
 0x802   :  { %v662_v39 = vrot.slane %v650_v51, %v1021_v15 }
 0x803   :  { %v670_v40 = vpop.permute.xlu1 %669 }
 0x804   :  { %v663_v43 = vsel %vm387_vm5, %v662_v39, %v658_v38 }
 0x805   :  { %v665_v36 = vsel %vm652_vm8, -1e+12, %v663_v43  ;;  %v667_v44 = vpop.permute.xlu0 %666 }
 0x806   :  { %v676_v45 = vsel %vm675_vm9, %v665_v36, %v667_v44 }
 0x807   :  { %v673_v46 = vpop.permute.xlu1 %672  ;;  %v678_v47 = vsel %vm677_vm10, %v676_v45, %v670_v40 }
 0x808   :  { %v680_v48 = vsel %vm679_vm11, %v678_v47, %v673_v46 }
 0x809   :  { %v682_v49 = vsel %vm681_vm12, %v680_v48, 0.0 }
 0x80a   :  { %683 = vst [vmem:[%s1105_s15] sm:$0x3] %v682_v49 }

</bundles_post_ra>
